<compile_context>
chip_gen: v7x
topology: tpu7x:2x2x1
jax: 0.10.0
libtpu: 0.0.40
codegen_flags: <defaults>
</compile_context>

<pallas_src>
import math
import jax
import jax.numpy as jnp
from jax.experimental import pallas as pl
from jax.experimental.pallas import tpu as pltpu

HID_PAD = 128  # GraphConvolution hidden (64) padded to one full lane width


def _round_up(x, m):
    return ((x + m - 1) // m) * m


def _pick_tile(n128, target, min_tiles=1):
    """Largest multiple of 128 that divides n128, is <= target, and (when
    possible) leaves at least `min_tiles` blocks along that axis."""
    best = 128
    t = 128
    while t <= min(target, n128):
        if n128 % t == 0 and (n128 // t) >= min_tiles:
            best = t
        t += 128
    return best


# ---------------------------------------------------------------------------
# Kernel: out_tile = relu( sum_k mx[i,k] @ (x[k] @ Wg) + bg ) @ W_fused + b_fused
# ---------------------------------------------------------------------------
def gcn_kernel(mx_ref, x_ref, wg_ref, bg_ref, wf_ref, bf_ref, o_ref, acc_ref):
    k = pl.program_id(1)

    @pl.when(k == 0)
    def _():
        acc_ref[...] = jnp.zeros_like(acc_ref)

    # Recompute the support tile for this K block: (tk, nfeat) @ (nfeat, 128).
    # nfeat is tiny, so this MXU work is free under the HBM-bound regime and
    # removes the HBM support slab entirely.
    sup = jnp.dot(
        x_ref[...], wg_ref[...], preferred_element_type=jnp.float32
    ).astype(jnp.bfloat16)

    # Dominant, bandwidth-bound stage: stream the mx tile, cast to bf16 on the
    # VPU, bf16 x bf16 -> f32 accumulate on the MXU.
    acc_ref[...] += jnp.dot(
        mx_ref[...].astype(jnp.bfloat16), sup, preferred_element_type=jnp.float32
    )

    @pl.when(k == pl.num_programs(1) - 1)
    def _():
        h = jnp.maximum(acc_ref[...] + bg_ref[...], 0.0)          # + bias, ReLU
        o_ref[...] = (
            jnp.dot(h, wf_ref[...], preferred_element_type=jnp.float32)
            + bf_ref[...]
        ).astype(o_ref.dtype)                                      # fused dense tail


# ---------------------------------------------------------------------------
# Wrapper
# ---------------------------------------------------------------------------
def gcn_forward(x, mx, params, *, tile_m=None, tile_k=None):
    """GCN forward: relu(mx @ (x @ Wg) + bg) -> fused (w1,w2,w3) dense."""
    n, f = x.shape
    nout = params["w3"].shape[1]
    nout_pad = _round_up(max(nout, 1), 128)

    # ---- parameter prep (tiny XLA ops outside the kernel) ----
    wg_pad = jnp.zeros((f, HID_PAD), jnp.float32).at[:, :64].set(params["wg"])
    bg_pad = jnp.zeros((1, HID_PAD), jnp.float32).at[:, :64].set(params["bg"])

    # fuse the three linear layers (no nonlinearity between them in eval mode)
    w_fused = params["w1"] @ params["w2"] @ params["w3"]                  # [64, nout]
    b_fused = (params["b1"] @ params["w2"] @ params["w3"]
               + params["b2"] @ params["w3"]
               + params["b3"])                                            # [1, nout]
    wf_pad = jnp.zeros((HID_PAD, nout_pad), jnp.float32).at[:64, :nout].set(w_fused)
    bf_pad = jnp.zeros((1, nout_pad), jnp.float32).at[:, :nout].set(b_fused)

    # ---- minimal node-dimension padding + divisor-safe tile selection ----
    n128 = _round_up(n, 128)
    target_m = tile_m if tile_m is not None else (1024 if n128 >= 4096 else 512)
    target_k = tile_k if tile_k is not None else 512
    tm = _pick_tile(n128, target_m, min_tiles=2)   # >=2 row tiles when possible (megacore)
    tk = _pick_tile(n128, target_k)
    assert n128 % tm == 0 and n128 % tk == 0, (n128, tm, tk)

    if n == n128:
        mx_in, x_in = mx, x        # no wrapper-side pad/cast pass over N^2 data
    else:
        mx_in = jnp.zeros((n128, n128), mx.dtype).at[:n, :n].set(mx)
        x_in = jnp.zeros((n128, f), x.dtype).at[:n, :].set(x)

    # NOTE: if DMA latency is still exposed on some generation after the tile
    # enlargement, add pipeline_mode=pl.Buffered(3) to the mx BlockSpec.
    out_pad = pl.pallas_call(
        gcn_kernel,
        out_shape=jax.ShapeDtypeStruct((n128, nout_pad), jnp.float32),
        grid_spec=pltpu.PrefetchScalarGridSpec(
            num_scalar_prefetch=0,
            grid=(n128 // tm, n128 // tk),
            in_specs=[
                pl.BlockSpec((tm, tk), lambda i, k: (i, k)),             # mx tile (stream)
                pl.BlockSpec((tk, f), lambda i, k: (k, 0)),              # x tile
                pl.BlockSpec((f, HID_PAD), lambda i, k: (0, 0)),         # Wg (resident)
                pl.BlockSpec((1, HID_PAD), lambda i, k: (0, 0)),         # bg (resident)
                pl.BlockSpec((HID_PAD, nout_pad), lambda i, k: (0, 0)),  # fused W (resident)
                pl.BlockSpec((1, nout_pad), lambda i, k: (0, 0)),        # fused b (resident)
            ],
            out_specs=pl.BlockSpec((tm, nout_pad), lambda i, k: (i, 0)),
            scratch_shapes=[pltpu.VMEM((tm, HID_PAD), jnp.float32)],
        ),
        compiler_params=pltpu.CompilerParams(
            dimension_semantics=("parallel", "arbitrary"),
            vmem_limit_bytes=32 * 1024 * 1024,
        ),
    )(mx_in, x_in, wg_pad, bg_pad, wf_pad, bf_pad)

    return out_pad[:n, :nout]


# ---------------------------------------------------------------------------
# Parameters / references
# ---------------------------------------------------------------------------
def init_params(key, nfeat, nout):
    """Deterministic init matching PyTorch reset_parameters (uniform +-stdv)."""
    def uni(k, shape, stdv):
        return jax.random.uniform(k, shape, jnp.float32, minval=-stdv, maxval=stdv)

    ks = jax.random.split(key, 8)
    s_g = 1.0 / math.sqrt(64)
    s_1 = 1.0 / math.sqrt(32)
    s_2 = 1.0 / math.sqrt(16)
    s_3 = 1.0 / math.sqrt(nout)
    return {
        "wg": uni(ks[0], (nfeat, 64), s_g),
        "bg": uni(ks[1], (1, 64), s_g),
        "w1": uni(ks[2], (64, 32), s_1),
        "b1": uni(ks[3], (1, 32), s_1),
        "w2": uni(ks[4], (32, 16), s_2),
        "b2": uni(ks[5], (1, 16), s_2),
        "w3": uni(ks[6], (16, nout), s_3),
        "b3": uni(ks[7], (1, nout), s_3),
    }


def gcn_reference_f32(x, mx, p):
    """Pure-f32 reference with the original (unfused) layer structure."""
    h = jnp.maximum(mx @ (x @ p["wg"]) + p["bg"], 0.0)
    h = h @ p["w1"] + p["b1"]
    h = h @ p["w2"] + p["b2"]
    h = h @ p["w3"] + p["b3"]
    return h


def gcn_reference_bf16(x, mx, p):
    """Reference mirroring the kernel's bf16 quantization of mx / support."""
    support = (x @ p["wg"]).astype(jnp.bfloat16)
    h = jnp.dot(mx.astype(jnp.bfloat16), support, preferred_element_type=jnp.float32)
    h = jnp.maximum(h + p["bg"], 0.0)
    h = h @ p["w1"] + p["b1"]
    h = h @ p["w2"] + p["b2"]
    h = h @ p["w3"] + p["b3"]
    return h


def _make_inputs(key, num_nodes, nfeat):
    k_x, k_adj = jax.random.split(key)
    x = jax.random.normal(k_x, (num_nodes, nfeat), jnp.float32)
    a = jax.random.uniform(k_adj, (num_nodes, num_nodes), jnp.float32)
    a = (a + a.T) * 0.5 + jnp.eye(num_nodes, dtype=jnp.float32)
    mx = a / jnp.sum(a, axis=1, keepdims=True)
    return x, mx


if __name__ == "__main__":
    key = jax.random.PRNGKey(0)
    k_in1, k_in2, k_p = jax.random.split(key, 3)

    nfeat, nout = 32, 8
    params = init_params(k_p, nfeat, nout)
    fwd = jax.jit(gcn_forward, static_argnames=("tile_m", "tile_k"))

    # case 1: tiny graph (single tile after padding)
    # case 2: ragged graph size (pads only to 384, grid (3, 1))
    # case 3: same ragged graph with tile_k=128 -> multi-step K reduction
    cases = (
        (k_in1, 8, {}),
        (k_in2, 300, {}),
        (k_in2, 300, {"tile_k": 128}),
    )
    for k_in, num_nodes, kwargs in cases:
        x, mx = _make_inputs(k_in, num_nodes, nfeat)

        out = jax.block_until_ready(fwd(x, mx, params, **kwargs))
        assert out.shape == (num_nodes, nout)

        # tight check vs a reference with identical bf16 quantization of mx/support
        ref_q = gcn_reference_bf16(x, mx, params)
        assert jnp.allclose(out, ref_q, atol=2e-3, rtol=2e-3), \
            f"mismatch vs bf16-mirroring reference (n={num_nodes}, {kwargs})"

        # loose check vs the pure-f32 original-module math
        ref = gcn_reference_f32(x, mx, params)
        assert jnp.allclose(out, ref, atol=2e-2, rtol=2e-2), \
            f"mismatch vs f32 reference (n={num_nodes}, {kwargs})"

    print("KERNEL_OK")
</pallas_src>

<mosaic_0001>
module attributes {stable_mosaic.version = 11 : i64} {
  func.func @gcn_kernel(%arg0: i32, %arg1: i32, %arg2: memref<128x128xf32, #tpu.memory_space<vmem>>, %arg3: memref<128x32xf32, #tpu.memory_space<vmem>>, %arg4: memref<32x128xf32, #tpu.memory_space<vmem>>, %arg5: memref<1x128xf32, #tpu.memory_space<vmem>>, %arg6: memref<128x128xf32, #tpu.memory_space<vmem>>, %arg7: memref<1x128xf32, #tpu.memory_space<vmem>>, %arg8: memref<128x128xf32, #tpu.memory_space<vmem>>, %arg9: memref<128x128xf32, #tpu.memory_space<vmem>>) attributes {dimension_semantics = [#tpu.dimension_semantics<parallel>, #tpu.dimension_semantics<arbitrary>], iteration_bounds = array<i64: 1, 1>, scalar_prefetch = 0 : i64, scratch_operands = 1 : i64, tpu.core_type = #tpu.core_type<tc>, window_params = [{transform_indices = @transform_0, window_bounds = array<i64: 128, 128>}, {transform_indices = @transform_1, window_bounds = array<i64: 128, 32>}, {pipeline_mode = #tpu.pipeline_mode<synchronous>, transform_indices = @transform_2, window_bounds = array<i64: 32, 128>}, {pipeline_mode = #tpu.pipeline_mode<synchronous>, transform_indices = @transform_3, window_bounds = array<i64: 1, 128>}, {pipeline_mode = #tpu.pipeline_mode<synchronous>, transform_indices = @transform_4, window_bounds = array<i64: 128, 128>}, {pipeline_mode = #tpu.pipeline_mode<synchronous>, transform_indices = @transform_5, window_bounds = array<i64: 1, 128>}, {transform_indices = @transform_6, window_bounds = array<i64: 128, 128>}]} {
    %c0_i32 = arith.constant 0 : i32
    %0 = arith.cmpi eq, %arg1, %c0_i32 : i32
    %1 = arith.extui %0 : i1 to i32
    %c0_i32_0 = arith.constant 0 : i32
    %2 = arith.cmpi ne, %1, %c0_i32_0 : i32
    scf.if %2 {
      %cst_13 = arith.constant 0.000000e+00 : f32
      %16 = vector.broadcast %cst_13 : f32 to vector<128x128xf32>
      %c0_14 = arith.constant 0 : index
      %c0_15 = arith.constant 0 : index
      %17 = vector.load %arg9[%c0_14, %c0_15] : memref<128x128xf32, #tpu.memory_space<vmem>>, vector<128x128xf32>
      tpu.vector_store %arg9[%c0_14, %c0_15], %16 {strides = array<i32>} : memref<128x128xf32, #tpu.memory_space<vmem>>, vector<128x128xf32>,
    } else {
    }
    %c0 = arith.constant 0 : index
    %c0_1 = arith.constant 0 : index
    %3 = vector.load %arg3[%c0, %c0_1] : memref<128x32xf32, #tpu.memory_space<vmem>>, vector<128x32xf32>
    %c0_2 = arith.constant 0 : index
    %c0_3 = arith.constant 0 : index
    %4 = vector.load %arg4[%c0_2, %c0_3] : memref<32x128xf32, #tpu.memory_space<vmem>>, vector<32x128xf32>
    %cst = arith.constant dense<0.000000e+00> : vector<128x128xf32>
    %5 = tpu.matmul %3, %4, %cst {dimension_numbers = #tpu.dot_dimension_numbers<[1], [0], [0], [1], [0, 0, 1, 1], [], []>} : vector<128x32xf32>, vector<32x128xf32>, vector<128x128xf32> -> vector<128x128xf32>
    %6 = arith.truncf %5 : vector<128x128xf32> to vector<128x128xbf16>
    %c0_4 = arith.constant 0 : index
    %c0_5 = arith.constant 0 : index
    %7 = vector.load %arg9[%c0_4, %c0_5] : memref<128x128xf32, #tpu.memory_space<vmem>>, vector<128x128xf32>
    %c0_6 = arith.constant 0 : index
    %c0_7 = arith.constant 0 : index
    %8 = vector.load %arg2[%c0_6, %c0_7] : memref<128x128xf32, #tpu.memory_space<vmem>>, vector<128x128xf32>
    %9 = arith.truncf %8 : vector<128x128xf32> to vector<128x128xbf16>
    %cst_8 = arith.constant dense<0.000000e+00> : vector<128x128xf32>
    %10 = tpu.matmul %9, %6, %cst_8 {dimension_numbers = #tpu.dot_dimension_numbers<[1], [0], [0], [1], [0, 0, 1, 1], [], []>} : vector<128x128xbf16>, vector<128x128xbf16>, vector<128x128xf32> -> vector<128x128xf32>
    %11 = arith.addf %7, %10 : vector<128x128xf32>
    %c0_9 = arith.constant 0 : index
    %c0_10 = arith.constant 0 : index
    %12 = vector.load %arg9[%c0_9, %c0_10] : memref<128x128xf32, #tpu.memory_space<vmem>>, vector<128x128xf32>
    tpu.vector_store %arg9[%c0_9, %c0_10], %11 {strides = array<i32>} : memref<128x128xf32, #tpu.memory_space<vmem>>, vector<128x128xf32>,
    %c0_i32_11 = arith.constant 0 : i32
    %13 = arith.cmpi eq, %arg1, %c0_i32_11 : i32
    %14 = arith.extui %13 : i1 to i32
    %c0_i32_12 = arith.constant 0 : i32
    %15 = arith.cmpi ne, %14, %c0_i32_12 : i32
    scf.if %15 {
      %c0_13 = arith.constant 0 : index
      %c0_14 = arith.constant 0 : index
      %16 = vector.load %arg9[%c0_13, %c0_14] : memref<128x128xf32, #tpu.memory_space<vmem>>, vector<128x128xf32>
      %c0_15 = arith.constant 0 : index
      %c0_16 = arith.constant 0 : index
      %17 = vector.load %arg5[%c0_15, %c0_16] : memref<1x128xf32, #tpu.memory_space<vmem>>, vector<1x128xf32>
      %18 = vector.broadcast %17 : vector<1x128xf32> to vector<128x128xf32>
      %19 = arith.addf %16, %18 : vector<128x128xf32>
      %cst_17 = arith.constant 0.000000e+00 : f32
      %20 = vector.broadcast %cst_17 : f32 to vector<128x128xf32>
      %21 = arith.maximumf %19, %20 : vector<128x128xf32>
      %c0_18 = arith.constant 0 : index
      %c0_19 = arith.constant 0 : index
      %22 = vector.load %arg6[%c0_18, %c0_19] : memref<128x128xf32, #tpu.memory_space<vmem>>, vector<128x128xf32>
      %cst_20 = arith.constant dense<0.000000e+00> : vector<128x128xf32>
      %23 = tpu.matmul %21, %22, %cst_20 {dimension_numbers = #tpu.dot_dimension_numbers<[1], [0], [0], [1], [0, 0, 1, 1], [], []>} : vector<128x128xf32>, vector<128x128xf32>, vector<128x128xf32> -> vector<128x128xf32>
      %c0_21 = arith.constant 0 : index
      %c0_22 = arith.constant 0 : index
      %24 = vector.load %arg7[%c0_21, %c0_22] : memref<1x128xf32, #tpu.memory_space<vmem>>, vector<1x128xf32>
      %25 = vector.broadcast %24 : vector<1x128xf32> to vector<128x128xf32>
      %26 = arith.addf %23, %25 : vector<128x128xf32>
      %c0_23 = arith.constant 0 : index
      %c0_24 = arith.constant 0 : index
      %27 = vector.load %arg8[%c0_23, %c0_24] : memref<128x128xf32, #tpu.memory_space<vmem>>, vector<128x128xf32>
      tpu.vector_store %arg8[%c0_23, %c0_24], %26 {strides = array<i32>} : memref<128x128xf32, #tpu.memory_space<vmem>>, vector<128x128xf32>,
    } else {
    }
    return
  }
  func.func @transform_0(%arg0: i32, %arg1: i32) -> (i32, i32) {
    %c0_i32 = arith.constant 0 : i32
    return %arg0, %arg1 : i32, i32
  }
  func.func @transform_1(%arg0: i32, %arg1: i32) -> (i32, i32) {
    %c0_i32 = arith.constant 0 : i32
    %c0_i32_0 = arith.constant 0 : i32
    return %arg1, %c0_i32 : i32, i32
  }
  func.func @transform_2(%arg0: i32, %arg1: i32) -> (i32, i32) {
    %c0_i32 = arith.constant 0 : i32
    %c0_i32_0 = arith.constant 0 : i32
    %c0_i32_1 = arith.constant 0 : i32
    return %c0_i32, %c0_i32_0 : i32, i32
  }
  func.func @transform_3(%arg0: i32, %arg1: i32) -> (i32, i32) {
    %c0_i32 = arith.constant 0 : i32
    %c0_i32_0 = arith.constant 0 : i32
    %c0_i32_1 = arith.constant 0 : i32
    return %c0_i32, %c0_i32_0 : i32, i32
  }
  func.func @transform_4(%arg0: i32, %arg1: i32) -> (i32, i32) {
    %c0_i32 = arith.constant 0 : i32
    %c0_i32_0 = arith.constant 0 : i32
    %c0_i32_1 = arith.constant 0 : i32
    return %c0_i32, %c0_i32_0 : i32, i32
  }
  func.func @transform_5(%arg0: i32, %arg1: i32) -> (i32, i32) {
    %c0_i32 = arith.constant 0 : i32
    %c0_i32_0 = arith.constant 0 : i32
    %c0_i32_1 = arith.constant 0 : i32
    return %c0_i32, %c0_i32_0 : i32, i32
  }
  func.func @transform_6(%arg0: i32, %arg1: i32) -> (i32, i32) {
    %c0_i32 = arith.constant 0 : i32
    %c0_i32_0 = arith.constant 0 : i32
    return %arg0, %c0_i32 : i32, i32
  }
}

</mosaic_0001>

<bundles_post_ra>
// kernel: gcn_forward.1
= control target key start
LH: loop header
LB: loop body
LE: loop exit
PB: predicated region body
PF: predicated region fallthrough
CT: control target
= control target key end

     0   :  { %vm64_vm0 = vcmask 261120   ;;  %s1246_s2 = inlined_call_operand.vmem [shape: f32[32,128], index: 2, kind: input, shape index: {}]   ;;  %s1247_s1 = inlined_call_operand.vmem [shape: f32[128,32], index: 1, kind: input, shape index: {}]   ;;  %s1248_s0 = inlined_call_operand.vmem [shape: f32[128,128], index: 0, kind: input, shape index: {}]   ;;  %s1249_s4 = inlined_call_operand.vmem [shape: f32[128,128], index: 4, kind: input, shape index: {}]   ;;  %s1250_s3 = inlined_call_operand.vmem [shape: f32[1,128], index: 3, kind: input, shape index: {}]   ;;  %s1251_s5 = inlined_call_operand.vmem [shape: f32[1,128], index: 5, kind: input, shape index: {}]   ;;  %s1252_s6 = inlined_call_operand.vmem [shape: f32[128,128], index: 6, kind: output, shape index: {}]  }
   0x1   :  { %v60_v0 = vld [vmem:[%s1246_s2] sm:$0xff]  ;;  %v61_v1 = vld [vmem:[%s1246_s2 + $0x8] sm:$0xff]  ;;  %v62_v2 = vld [vmem:[%s1246_s2 + $0x10] sm:$0xff] }
   0x2   :  { %v887_v3 = vpack.c.bf16 %v61_v1, %v60_v0  ;;  %v63_v4 = vld [vmem:[%s1246_s2 + $0x18] sm:$0xff]  ;;  %v44_v5 = vld [vmem:[%s1247_s1] sm:$0xff]  ;;  %v45_v7 = vld [vmem:[%s1247_s1 + $0x8] sm:$0xff] }
   0x3   :  { %v891_v6 = vpack.c.bf16 %v63_v4, %v62_v2  ;;  %775 = vmatprep.mubr.msk.f32.mxu0 %vm64_vm0, %v44_v5  ;;  %v46_v8 = vld [vmem:[%s1247_s1 + $0x10] sm:$0xff]  ;;  %v47_v9 = vld [vmem:[%s1247_s1 + $0x18] sm:$0xff]  ;;  %v48_v10 = vld [vmem:[%s1247_s1 + $0x20] sm:$0xff] }
   0x4   :  { %888 = vmatprep.subr.bf16.mxu0 %v887_v3  ;;  %v49_v11 = vld [vmem:[%s1247_s1 + $0x28] sm:$0xff]  ;;  %v50_v12 = vld [vmem:[%s1247_s1 + $0x30] sm:$0xff]  ;;  %v51_v13 = vld [vmem:[%s1247_s1 + $0x38] sm:$0xff] }
   0x5   :  { %890 = vmatpush3.bf16.msra.mxu0 %v887_v3  ;;  %v52_v14 = vld [vmem:[%s1247_s1 + $0x40] sm:$0xff]  ;;  %v53_v15 = vld [vmem:[%s1247_s1 + $0x48] sm:$0xff]  ;;  %v54_v16 = vld [vmem:[%s1247_s1 + $0x50] sm:$0xff] }
   0x6   :  { %892 = vmatprep.subr.bf16.mxu0 %v891_v6  ;;  %v55_v17 = vld [vmem:[%s1247_s1 + $0x58] sm:$0xff]  ;;  %v56_v18 = vld [vmem:[%s1247_s1 + $0x60] sm:$0xff]  ;;  %v57_v19 = vld [vmem:[%s1247_s1 + $0x68] sm:$0xff] }
   0x7   :  { %v58_v20 = vld [vmem:[%s1247_s1 + $0x70] sm:$0xff]  ;;  %v59_v21 = vld [vmem:[%s1247_s1 + $0x78] sm:$0xff]  ;;  %v282_v22 = vld [vmem:[%s1248_s0] sm:$0xff] }
   0x8   :  { %v283_v23 = vld [vmem:[%s1248_s0 + $0x8] sm:$0xff]  ;;  %v493_v25 = vld [vmem:[%s1249_s4] sm:$0xff]  ;;  %v495_v27 = vld [vmem:[%s1249_s4 + $0x10] sm:$0xff] }
   0x9   :  { %894 = vmatpush3.bf16.msra.mxu0 %v891_v6  ;;  %v298_v24 = vpack.c.bf16 %v283_v23, %v282_v22  ;;  %v494_v26 = vld [vmem:[%s1249_s4 + $0x8] sm:$0xff]  ;;  %v496_v29 = vld [vmem:[%s1249_s4 + $0x18] sm:$0xff]  ;;  %v497_v31 = vld [vmem:[%s1249_s4 + $0x20] sm:$0xff] }
   0xa   :  { %v1069_v28 = vpack.c.bf16 %v494_v26, %v493_v25  ;;  %v1074_v30 = vpack.c.bf16 %v496_v29, %v495_v27  ;;  %v498_v32 = vld [vmem:[%s1249_s4 + $0x28] sm:$0xff]  ;;  %v499_v34 = vld [vmem:[%s1249_s4 + $0x30] sm:$0xff]  ;;  %v500_v35 = vld [vmem:[%s1249_s4 + $0x38] sm:$0xff] }
   0xb   :  { %815 = vmatprep.mubr.bf16.mxu1 %v298_v24  ;;  %v1085_v33 = vpack.c.bf16 %v498_v32, %v497_v31  ;;  %v1095_v36 = vpack.c.bf16 %v500_v35, %v499_v34  ;;  %v501_v37 = vld [vmem:[%s1249_s4 + $0x40] sm:$0xff]  ;;  %v502_v38 = vld [vmem:[%s1249_s4 + $0x48] sm:$0xff]  ;;  %v503_v40 = vld [vmem:[%s1249_s4 + $0x50] sm:$0xff] }
   0xc   :  { %776 = vmatmul.mubr.msk.f32.vlgmr.msra.gmra.mrb[0].mxu0 %vm64_vm0, %v45_v7  ;;  %896 = vmatprep.subr.bf16.mxu0 %v1069_v28  ;;  %v1105_v39 = vpack.c.bf16 %v502_v38, %v501_v37  ;;  %v504_v41 = vld [vmem:[%s1249_s4 + $0x58] sm:$0xff]  ;;  %v505_v43 = vld [vmem:[%s1249_s4 + $0x60] sm:$0xff]  ;;  %v506_v44 = vld [vmem:[%s1249_s4 + $0x68] sm:$0xff] }
   0xd   :  { %778 = vmatprep.mubr.msk.f32.mxu0 %vm64_vm0, %v46_v8  ;;  %898 = vmatpush3.bf16.msra.mxu0 %v1069_v28  ;;  %v1115_v42 = vpack.c.bf16 %v504_v41, %v503_v40  ;;  %v1125_v45 = vpack.c.bf16 %v506_v44, %v505_v43  ;;  %v284_v5 = vld [vmem:[%s1248_s0 + $0x10] sm:$0xff]  ;;  %v285_v6 = vld [vmem:[%s1248_s0 + $0x18] sm:$0xff]  ;;  %v286_v8 = vld [vmem:[%s1248_s0 + $0x20] sm:$0xff] }
   0xe   :  { %900 = vmatprep.subr.bf16.mxu0 %v1074_v30  ;;  %v296_v24 = vld [vmem:[%s1248_s0 + $0x70] sm:$0xff]  ;;  %v297_v25 = vld [vmem:[%s1248_s0 + $0x78] sm:$0xff] }
   0xf   :  { %v305_v26 = vpack.c.bf16 %v297_v25, %v296_v24  ;;  %v507_v27 = vld [vmem:[%s1249_s4 + $0x70] sm:$0xff] }
  0x10   :  { %779 = vmatmul.mubr.msk.f32.gmra.mrb[2].mxu0 %vm64_vm0, %v47_v9  ;;  %v287_v9 = vld [vmem:[%s1248_s0 + $0x28] sm:$0xff] }
  0x11   :  { %781 = vmatprep.mubr.msk.f32.mxu0 %vm64_vm0, %v48_v10  ;;  %902 = vmatpush3.bf16.msra.mxu0 %v1074_v30  ;;  %v299_v10 = vpack.c.bf16 %v285_v6, %v284_v5 }
  0x12   :  { %904 = vmatprep.subr.bf16.mxu0 %v1085_v33 }
  0x14   :  { %782 = vmatmul.mubr.msk.f32.gmra.mrb[4].mxu0 %vm64_vm0, %v49_v11  ;;  %v300_v11 = vpack.c.bf16 %v287_v9, %v286_v8 }
  0x15   :  { %784 = vmatprep.mubr.msk.f32.mxu0 %vm64_vm0, %v50_v12  ;;  %906 = vmatpush3.bf16.msra.mxu0 %v1085_v33  ;;  %v288_v12 = vld [vmem:[%s1248_s0 + $0x30] sm:$0xff] }
  0x16   :  { %908 = vmatprep.subr.bf16.mxu0 %v1095_v36 }
  0x18   :  { %785 = vmatmul.mubr.msk.f32.gmra.mrb[6].mxu0 %vm64_vm0, %v51_v13  ;;  %v289_v13 = vld [vmem:[%s1248_s0 + $0x38] sm:$0xff] }
  0x19   :  { %787 = vmatprep.mubr.msk.f32.mxu0 %vm64_vm0, %v52_v14  ;;  %910 = vmatpush3.bf16.msra.mxu0 %v1095_v36  ;;  %v290_v14 = vld [vmem:[%s1248_s0 + $0x40] sm:$0xff] }
  0x1a   :  { %912 = vmatprep.subr.bf16.mxu0 %v1105_v39 }
  0x1c   :  { %788 = vmatmul.mubr.msk.f32.gmra.mrb[8].mxu0 %vm64_vm0, %v53_v15  ;;  %v291_v15 = vld [vmem:[%s1248_s0 + $0x48] sm:$0xff] }
  0x1d   :  { %790 = vmatprep.mubr.msk.f32.mxu0 %vm64_vm0, %v54_v16  ;;  %914 = vmatpush3.bf16.msra.mxu0 %v1105_v39  ;;  %v301_v16 = vpack.c.bf16 %v289_v13, %v288_v12 }
  0x1e   :  { %916 = vmatprep.subr.bf16.mxu0 %v1115_v42 }
  0x20   :  { %791 = vmatmul.mubr.msk.f32.gmra.mrb[10].mxu0 %vm64_vm0, %v55_v17  ;;  %v302_v17 = vpack.c.bf16 %v291_v15, %v290_v14  ;;  %v698_v15 = vld [vmem:[%s1251_s5] ss:$0 sm:$0xff] }
  0x21   :  { %793 = vmatprep.mubr.msk.f32.mxu0 %vm64_vm0, %v56_v18  ;;  %918 = vmatpush3.bf16.msra.mxu0 %v1115_v42  ;;  %v292_v18 = vld [vmem:[%s1248_s0 + $0x50] sm:$0xff] }
  0x22   :  { %920 = vmatprep.subr.bf16.mxu0 %v1125_v45 }
  0x24   :  { %794 = vmatmul.mubr.msk.f32.gmra.mrb[12].mxu0 %vm64_vm0, %v57_v19  ;;  %v293_v19 = vld [vmem:[%s1248_s0 + $0x58] sm:$0xff] }
  0x25   :  { %796 = vmatprep.mubr.msk.f32.mxu0 %vm64_vm0, %v58_v20  ;;  %922 = vmatpush3.bf16.msra.mxu0 %v1125_v45  ;;  %v294_v20 = vld [vmem:[%s1248_s0 + $0x60] sm:$0xff]  ;;  %v303_v22 = vpack.c.bf16 %v293_v19, %v292_v18 }
  0x28   :  { %797 = vmatmul.mubr.msk.f32.gmra.mrb[14].mxu0 %vm64_vm0, %v59_v21  ;;  %v295_v21 = vld [vmem:[%s1248_s0 + $0x68] sm:$0xff] }
  0x29   :  { %v304_v23 = vpack.c.bf16 %v295_v21, %v294_v20 }
  0xdf   :  { %v777_v46 = vpop.f32.mrb[0].mxu0 }
  0xe0   :  { %v179_v47 = vpop.f32.mrb[1].mxu0 }
  0xe1   :  { %v258_v48 = vpack.c.bf16 %v777_v46, %v179_v47 }
  0xe3   :  { %v780_v49 = vpop.f32.mrb[2].mxu0  ;;  %799 = vmatprep.subr.bf16.mxu1 %v258_v48 }
  0xe4   :  { %v189_v50 = vpop.f32.mrb[3].mxu0  ;;  %800 = vmatpush3.bf16.msra.mxu1 %v258_v48 }
  0xe5   :  { %v259_v51 = vpack.c.bf16 %v780_v49, %v189_v50 }
  0xe7   :  { %v783_v52 = vpop.f32.mrb[4].mxu0  ;;  %801 = vmatprep.subr.bf16.mxu1 %v259_v51 }
  0xe8   :  { %v199_v53 = vpop.f32.mrb[5].mxu0  ;;  %802 = vmatpush3.bf16.msra.mxu1 %v259_v51 }
  0xe9   :  { %v260_v54 = vpack.c.bf16 %v783_v52, %v199_v53 }
  0xeb   :  { %v786_v55 = vpop.f32.mrb[6].mxu0  ;;  %803 = vmatprep.subr.bf16.mxu1 %v260_v54 }
  0xec   :  { %v209_v56 = vpop.f32.mrb[7].mxu0  ;;  %804 = vmatpush3.bf16.msra.mxu1 %v260_v54 }
  0xed   :  { %v261_v57 = vpack.c.bf16 %v786_v55, %v209_v56 }
  0xef   :  { %v789_v58 = vpop.f32.mrb[8].mxu0  ;;  %805 = vmatprep.subr.bf16.mxu1 %v261_v57 }
  0xf0   :  { %v219_v59 = vpop.f32.mrb[9].mxu0  ;;  %806 = vmatpush3.bf16.msra.mxu1 %v261_v57 }
  0xf1   :  { %v262_v60 = vpack.c.bf16 %v789_v58, %v219_v59 }
  0xf3   :  { %v792_v61 = vpop.f32.mrb[10].mxu0  ;;  %807 = vmatprep.subr.bf16.mxu1 %v262_v60 }
  0xf4   :  { %v229_v62 = vpop.f32.mrb[11].mxu0  ;;  %808 = vmatpush3.bf16.msra.mxu1 %v262_v60 }
  0xf5   :  { %v263_v63 = vpack.c.bf16 %v792_v61, %v229_v62 }
  0xf7   :  { %v795_v0 = vpop.f32.mrb[12].mxu0  ;;  %809 = vmatprep.subr.bf16.mxu1 %v263_v63 }
  0xf8   :  { %v239_v1 = vpop.f32.mrb[13].mxu0  ;;  %810 = vmatpush3.bf16.msra.mxu1 %v263_v63 }
  0xf9   :  { %v264_v2 = vpack.c.bf16 %v795_v0, %v239_v1 }
  0xfb   :  { %v798_v3 = vpop.f32.mrb[14].mxu0  ;;  %811 = vmatprep.subr.bf16.mxu1 %v264_v2 }
  0xfc   :  { %v249_v4 = vpop.f32.mrb[15].mxu0  ;;  %812 = vmatpush3.bf16.msra.mxu1 %v264_v2 }
  0xfd   :  { %v265_v7 = vpack.c.bf16 %v798_v3, %v249_v4 }
  0xff   :  { %813 = vmatprep.subr.bf16.mxu1 %v265_v7 }
 0x100   :  { %814 = vmatpush3.bf16.msra.mxu1 %v265_v7 }
 0x101   :  { %927 = vmatprep.subr.bf16.mxu1 %v1069_v28 }
 0x103   :  { %816 = vmatmul.mubr.bf16.vlgmr.msra.gmra.mrb[0].mxu1 %v299_v10 }
 0x104   :  { %819 = vmatprep.mubr.bf16.mxu1 %v300_v11  ;;  %935 = vmatpush3.bf16.msra.mxu1 %v1069_v28  ;;  %v508_v28 = vld [vmem:[%s1249_s4 + $0x78] sm:$0xff] }
 0x105   :  { %928 = vmatprep.subr.bf16.mxu1 %v1074_v30  ;;  %v923_v29 = vpack.c.bf16 %v508_v28, %v507_v27 }
 0x107   :  { %924 = vmatprep.subr.bf16.mxu0 %v923_v29 }
 0x108   :  { %936 = vmatpush3.bf16.msra.mxu1 %v1074_v30  ;;  %926 = vmatpush3.bf16.msra.mxu0 %v923_v29  ;;  %v697_v30 = vld [vmem:[%s1250_s3] ss:$0 sm:$0xff] }
 0x109   :  { %929 = vmatprep.subr.bf16.mxu1 %v1085_v33 }
 0x10b   :  { %820 = vmatmul.mubr.bf16.gmra.mrb[4].mxu1 %v301_v16 }
 0x10c   :  { %823 = vmatprep.mubr.bf16.mxu1 %v302_v17  ;;  %937 = vmatpush3.bf16.msra.mxu1 %v1085_v33 }
 0x10d   :  { %930 = vmatprep.subr.bf16.mxu1 %v1095_v36 }
 0x110   :  { %938 = vmatpush3.bf16.msra.mxu1 %v1095_v36 }
 0x111   :  { %931 = vmatprep.subr.bf16.mxu1 %v1105_v39 }
 0x113   :  { %824 = vmatmul.mubr.bf16.gmra.mrb[8].mxu1 %v303_v22 }
 0x114   :  { %827 = vmatprep.mubr.bf16.mxu1 %v304_v23  ;;  %939 = vmatpush3.bf16.msra.mxu1 %v1105_v39 }
 0x115   :  { %932 = vmatprep.subr.bf16.mxu1 %v1115_v42 }
 0x118   :  { %940 = vmatpush3.bf16.msra.mxu1 %v1115_v42 }
 0x119   :  { %933 = vmatprep.subr.bf16.mxu1 %v1125_v45 }
 0x11b   :  { %828 = vmatmul.mubr.bf16.gmra.mrb[12].mxu1 %v305_v26 }
 0x11c   :  { %941 = vmatpush3.bf16.msra.mxu1 %v1125_v45 }
 0x11d   :  { %934 = vmatprep.subr.bf16.mxu1 %v923_v29 }
 0x120   :  { %942 = vmatpush3.bf16.msra.mxu1 %v923_v29 }
 0x1d6   :  { %v817_v31 = vpop.f32.mrb[0].mxu1 }
 0x1d7   :  { %v340_v32 = vpop.f32.mrb[1].mxu1  ;;  %v463_v35 = vadd.f32 %v817_v31, %v697_v30 }
 0x1d8   :  { %v461_v33 = vadd.f32 %v697_v30, %v340_v32  ;;  %v818_v34 = vpop.f32.mrb[2].mxu1 }
 0x1d9   :  { %v343_v36 = vpop.f32.mrb[3].mxu1  ;;  %v464_v39 = vadd.f32 %v818_v34, %v697_v30  ;;  %v479_v41 = vmax.f32 %v463_v35, 0.0 }
 0x1da   :  { %v477_v37 = vmax.f32 %v461_v33, 0.0  ;;  %v462_v38 = vadd.f32 %v697_v30, %v343_v36 }
 0x1db   :  { %v480_v44 = vmax.f32 %v464_v39, 0.0 }
 0x1dc   :  { %v478_v40 = vmax.f32 %v462_v38, 0.0  ;;  %863 = vmatprep.mubr.f32.mxu0 %v477_v37 }
 0x1de   :  { %v821_v42 = vpop.f32.mrb[4].mxu1  ;;  %864 = vmatmul.mubr.f32.vlgmr.msra.gmra.mrb[16].mxu0 %v478_v40 }
 0x1df   :  { %v356_v43 = vpop.f32.mrb[5].mxu1  ;;  %866 = vmatprep.mubr.f32.mxu0 %v479_v41  ;;  %v467_v47 = vadd.f32 %v821_v42, %v697_v30 }
 0x1e0   :  { %v465_v45 = vadd.f32 %v697_v30, %v356_v43  ;;  %v822_v46 = vpop.f32.mrb[6].mxu1 }
 0x1e1   :  { %v359_v48 = vpop.f32.mrb[7].mxu1  ;;  %v468_v51 = vadd.f32 %v822_v46, %v697_v30  ;;  %v483_v53 = vmax.f32 %v467_v47, 0.0 }
 0x1e2   :  { %v481_v49 = vmax.f32 %v465_v45, 0.0  ;;  %v466_v50 = vadd.f32 %v697_v30, %v359_v48  ;;  %867 = vmatmul.mubr.f32.gmra.mrb[18].mxu0 %v480_v44 }
 0x1e3   :  { %v484_v56 = vmax.f32 %v468_v51, 0.0 }
 0x1e4   :  { %v482_v52 = vmax.f32 %v466_v50, 0.0  ;;  %869 = vmatprep.mubr.f32.mxu0 %v481_v49 }
 0x1e6   :  { %v825_v54 = vpop.f32.mrb[8].mxu1  ;;  %870 = vmatmul.mubr.f32.gmra.mrb[20].mxu0 %v482_v52 }
 0x1e7   :  { %v372_v55 = vpop.f32.mrb[9].mxu1  ;;  %872 = vmatprep.mubr.f32.mxu0 %v483_v53  ;;  %v471_v59 = vadd.f32 %v825_v54, %v697_v30 }
 0x1e8   :  { %v469_v57 = vadd.f32 %v697_v30, %v372_v55  ;;  %v826_v58 = vpop.f32.mrb[10].mxu1 }
 0x1e9   :  { %v375_v60 = vpop.f32.mrb[11].mxu1  ;;  %v472_v63 = vadd.f32 %v826_v58, %v697_v30  ;;  %v487_v1 = vmax.f32 %v471_v59, 0.0 }
 0x1ea   :  { %v485_v61 = vmax.f32 %v469_v57, 0.0  ;;  %v470_v62 = vadd.f32 %v697_v30, %v375_v60  ;;  %873 = vmatmul.mubr.f32.gmra.mrb[22].mxu0 %v484_v56 }
 0x1eb   :  { %v488_v5 = vmax.f32 %v472_v63, 0.0 }
 0x1ec   :  { %v486_v0 = vmax.f32 %v470_v62, 0.0  ;;  %875 = vmatprep.mubr.f32.mxu0 %v485_v61 }
 0x1ee   :  { %v829_v2 = vpop.f32.mrb[12].mxu1  ;;  %876 = vmatmul.mubr.f32.gmra.mrb[24].mxu0 %v486_v0 }
 0x1ef   :  { %v475_v3 = vadd.f32 %v829_v2, %v697_v30  ;;  %v388_v4 = vpop.f32.mrb[13].mxu1  ;;  %878 = vmatprep.mubr.f32.mxu0 %v487_v1 }
 0x1f0   :  { %v473_v6 = vadd.f32 %v697_v30, %v388_v4  ;;  %v830_v7 = vpop.f32.mrb[14].mxu1 }
 0x1f1   :  { %v491_v8 = vmax.f32 %v475_v3, 0.0  ;;  %v476_v9 = vadd.f32 %v830_v7, %v697_v30  ;;  %v391_v10 = vpop.f32.mrb[15].mxu1 }
 0x1f2   :  { %v489_v11 = vmax.f32 %v473_v6, 0.0  ;;  %v474_v12 = vadd.f32 %v697_v30, %v391_v10  ;;  %879 = vmatmul.mubr.f32.gmra.mrb[26].mxu0 %v488_v5 }
 0x1f3   :  { %v492_v13 = vmax.f32 %v476_v9, 0.0  ;;  %884 = vmatprep.mubr.f32.mxu1 %v491_v8 }
 0x1f4   :  { %v490_v14 = vmax.f32 %v474_v12, 0.0  ;;  %881 = vmatprep.mubr.f32.mxu0 %v489_v11 }
 0x1f5   :  { %885 = vmatmul.mubr.f32.vlgmr.msra.gmra.mrb[16].mxu1 %v492_v13 }
 0x1f6   :  { %882 = vmatmul.mubr.f32.gmra.mrb[28].mxu0 %v490_v14 }
 0x2b1   :  { %v865_v16 = vpop.f32.mrb[16].mxu0 }
 0x2b2   :  { %v588_v17 = vadd.f32 %v865_v16, %v698_v15  ;;  %v582_v18 = vpop.f32.mrb[17].mxu0 }
 0x2b3   :  { %v583_v19 = vadd.f32 %v698_v15, %v582_v18 }
 0x2b4   :  { %662 = vst [vmem:[%s1252_s6 + $0x8] sm:$0xff] %v588_v17 }
 0x2b5   :  { %661 = vst [vmem:[%s1252_s6] sm:$0xff] %v583_v19  ;;  %v868_v20 = vpop.f32.mrb[18].mxu0 }
 0x2b6   :  { %v598_v21 = vadd.f32 %v868_v20, %v698_v15  ;;  %v592_v22 = vpop.f32.mrb[19].mxu0 }
 0x2b7   :  { %v593_v23 = vadd.f32 %v698_v15, %v592_v22 }
 0x2b8   :  { %664 = vst [vmem:[%s1252_s6 + $0x18] sm:$0xff] %v598_v21 }
 0x2b9   :  { %663 = vst [vmem:[%s1252_s6 + $0x10] sm:$0xff] %v593_v23  ;;  %v871_v24 = vpop.f32.mrb[20].mxu0 }
 0x2ba   :  { %v608_v25 = vadd.f32 %v871_v24, %v698_v15  ;;  %v602_v26 = vpop.f32.mrb[21].mxu0 }
 0x2bb   :  { %v603_v27 = vadd.f32 %v698_v15, %v602_v26 }
 0x2bc   :  { %666 = vst [vmem:[%s1252_s6 + $0x28] sm:$0xff] %v608_v25 }
 0x2bd   :  { %665 = vst [vmem:[%s1252_s6 + $0x20] sm:$0xff] %v603_v27  ;;  %v874_v28 = vpop.f32.mrb[22].mxu0 }
 0x2be   :  { %v618_v29 = vadd.f32 %v874_v28, %v698_v15  ;;  %v612_v30 = vpop.f32.mrb[23].mxu0 }
 0x2bf   :  { %v613_v31 = vadd.f32 %v698_v15, %v612_v30 }
 0x2c0   :  { %668 = vst [vmem:[%s1252_s6 + $0x38] sm:$0xff] %v618_v29 }
 0x2c1   :  { %667 = vst [vmem:[%s1252_s6 + $0x30] sm:$0xff] %v613_v31  ;;  %v877_v32 = vpop.f32.mrb[24].mxu0 }
 0x2c2   :  { %v628_v33 = vadd.f32 %v877_v32, %v698_v15  ;;  %v622_v34 = vpop.f32.mrb[25].mxu0 }
 0x2c3   :  { %v623_v35 = vadd.f32 %v698_v15, %v622_v34 }
 0x2c4   :  { %670 = vst [vmem:[%s1252_s6 + $0x48] sm:$0xff] %v628_v33 }
 0x2c5   :  { %669 = vst [vmem:[%s1252_s6 + $0x40] sm:$0xff] %v623_v35  ;;  %v880_v36 = vpop.f32.mrb[26].mxu0 }
 0x2c6   :  { %v638_v37 = vadd.f32 %v880_v36, %v698_v15  ;;  %v632_v38 = vpop.f32.mrb[27].mxu0 }
 0x2c7   :  { %v633_v39 = vadd.f32 %v698_v15, %v632_v38 }
 0x2c8   :  { %672 = vst [vmem:[%s1252_s6 + $0x58] sm:$0xff] %v638_v37  ;;  %v886_v40 = vpop.f32.mrb[16].mxu1 }
 0x2c9   :  { %671 = vst [vmem:[%s1252_s6 + $0x50] sm:$0xff] %v633_v39  ;;  %v658_v41 = vadd.f32 %v886_v40, %v698_v15  ;;  %v883_v42 = vpop.f32.mrb[28].mxu0  ;;  %v652_v43 = vpop.f32.mrb[17].mxu1 }
 0x2ca   :  { %v648_v44 = vadd.f32 %v883_v42, %v698_v15  ;;  %v653_v45 = vadd.f32 %v698_v15, %v652_v43  ;;  %v642_v46 = vpop.f32.mrb[29].mxu0 }
 0x2cb   :  { %676 = vst [vmem:[%s1252_s6 + $0x78] sm:$0xff] %v658_v41  ;;  %v643_v47 = vadd.f32 %v698_v15, %v642_v46 }
 0x2cc   :  { %674 = vst [vmem:[%s1252_s6 + $0x68] sm:$0xff] %v648_v44  ;;  %675 = vst [vmem:[%s1252_s6 + $0x70] sm:$0xff] %v653_v45 }
 0x2cd   :  { %673 = vst [vmem:[%s1252_s6 + $0x60] sm:$0xff] %v643_v47 }

</bundles_post_ra>
